<compile_context>
chip_gen: v6e
topology: v6e:2x2x1
jax: 0.10.0
libtpu: 0.0.40
codegen_flags: <defaults>
</compile_context>

<pallas_src>
import functools

import jax
import jax.numpy as jnp
from jax import lax
from jax.experimental import pallas as pl
from jax.experimental.pallas import tpu as pltpu

LANE = 128
_SUBLANE = 8


def _round_up(x, m):
    return ((x + m - 1) // m) * m


# --------------------------------------------------------------------------
# Kernel
# --------------------------------------------------------------------------
def _attention_head_kernel(inv_scale, s_valid, approx_recip,
                           q_ref, k_ref, v_ref, w_ref, b_ref, o_ref,
                           qp_sc, m_sc, l_sc, acc_sc):
    kv = pl.program_id(1)
    bt, s_pad, d_in = q_ref.shape
    tk = k_ref.shape[1]
    p = w_ref.shape[-1]
    mm_dtype = qp_sc.dtype

    def project(x, idx):
        # One (rows, D_in_pad) x (D_in_pad, P) MXU matmul; K and N are
        # lane-dense (multiples of 128), f32 accumulation, f32 bias add.
        rows = x.shape[0] * x.shape[1]
        y = jnp.dot(x.reshape(rows, d_in), w_ref[idx],
                    preferred_element_type=jnp.float32)
        y = y + b_ref[idx]                                   # (1, P) broadcast
        return y.reshape(x.shape[0], x.shape[1], p)

    @pl.when(kv == 0)
    def _init():
        # Project q once per batch block; fold 1/sqrt(dim_q) here (SxP
        # elements) instead of into the SxS scores.
        q = project(q_ref[...], 0) * inv_scale
        qp_sc[...] = q.astype(mm_dtype)
        m_sc[...] = jnp.full(m_sc.shape, -jnp.inf, m_sc.dtype)
        l_sc[...] = jnp.zeros(l_sc.shape, l_sc.dtype)
        acc_sc[...] = jnp.zeros(acc_sc.shape, acc_sc.dtype)

    # Project this KV tile (each key/value row is projected exactly once).
    k = project(k_ref[...], 1)
    v = project(v_ref[...], 2)

    # Scores for this tile; feature axis contracted directly (no k.T / XLU
    # transpose materialized), f32 accumulation.
    s = jnp.einsum("bqd,bkd->bqk", qp_sc[...], k.astype(mm_dtype),
                   preferred_element_type=jnp.float32)
    if s_pad != s_valid:
        # Mask zero-padded key rows (their projection equals the bias, which
        # would otherwise leak into the softmax denominator).
        col = lax.broadcasted_iota(jnp.int32, s.shape, 2) + kv * tk
        s = jnp.where(col < s_valid, s, -jnp.inf)

    # Online-softmax update (exp runs on the EUP slot).
    m_prev = m_sc[...]
    m_new = jnp.maximum(m_prev, jnp.max(s, axis=-1, keepdims=True))
    alpha = jnp.exp(m_prev - m_new)
    p_e = jnp.exp(s - m_new)
    l_sc[...] = alpha * l_sc[...] + jnp.sum(p_e, axis=-1, keepdims=True)
    acc_sc[...] = alpha * acc_sc[...] + jnp.einsum(
        "bqk,bkd->bqd", p_e.astype(mm_dtype), v.astype(mm_dtype),
        preferred_element_type=jnp.float32)
    m_sc[...] = m_new

    @pl.when(kv == pl.num_programs(1) - 1)
    def _finalize():
        if approx_recip:
            out = acc_sc[...] * pl.reciprocal(l_sc[...], approx=True)
        else:
            out = acc_sc[...] / l_sc[...]
        # Store only the true dim_k columns: avoids an up-to-8x padded HBM
        # write plus an external slice pass when dim_k << 128.
        o_ref[...] = out[:, :, : o_ref.shape[-1]].astype(o_ref.dtype)


# --------------------------------------------------------------------------
# VMEM budgeting / tile planning (review-corrected accounting)
# --------------------------------------------------------------------------
def _vmem_limits():
    """Returns (vmem_limit_bytes for CompilerParams, tile-sizing budget)."""
    phys = 64 * 1024 * 1024          # v7x per-core floor; v5e/v6e have 128 MiB
    try:
        cap = int(getattr(pltpu.get_tpu_info(), "vmem_capacity_bytes", 0) or 0)
        if cap > 0:
            phys = cap
    except Exception:
        pass
    vmem_limit = int(phys * 0.85)    # headroom for Mosaic-internal scratch
    budget = int(vmem_limit * 0.80)  # sizing budget for the estimated live set
    return vmem_limit, budget


def _live_vmem_bytes(bt, tk, s_pad, *, d_in_pad, p_pad, dim_k, in_item,
                     w_item, c_item, single_buffer_weights):
    """Approximate per-step VMEM live set."""
    pipeline = 2 * (bt * s_pad * d_in_pad * in_item          # q block (x2 bufs)
                    + 2 * bt * tk * d_in_pad * in_item       # k, v blocks
                    + bt * s_pad * dim_k * 4)                # output block
    wbufs = (1 if single_buffer_weights else 2) * 3 * (
        d_in_pad * p_pad * w_item + _SUBLANE * p_pad * 4)    # weights + bias
    scratch = (bt * s_pad * p_pad * (c_item + 4)             # projected q + acc
               + 2 * bt * s_pad * LANE * 4)                  # m, l (lane-padded)
    temps = (2 * bt * tk * p_pad * 4                         # projected k, v (f32)
             + 3 * bt * s_pad * tk * 4                       # scores / exp / mask
             + bt * s_pad * tk * c_item                      # softmax cast for PV
             + 2 * bt * tk * p_pad * c_item                  # k/v matmul casts
             + bt * s_pad * p_pad * 4)                       # finalize temporary
    return pipeline + wbufs + scratch + temps


def _plan_tiles(batch, seq, *, budget_bytes, **kw):
    """Pick (batch block, kv tile, padded seq) against the VMEM budget."""
    tk = _round_up(seq, _SUBLANE) if seq <= 1024 else 512
    while True:
        s_pad = _round_up(seq, tk)
        bt = batch
        while bt > 1 and (batch % bt or
                          _live_vmem_bytes(bt, tk, s_pad, **kw) > budget_bytes):
            bt -= 1
        if _live_vmem_bytes(bt, tk, s_pad, **kw) <= budget_bytes or tk <= LANE:
            break
        tk = max(LANE, _round_up(tk // 2, _SUBLANE))         # shrink KV tile last
    # Keep >= 2 batch-grid steps when possible so CORE_PARALLEL can feed both
    # v7x TensorCores (no effect on single-core v5e/v6e).
    if bt == batch and batch > 1 and batch % 2 == 0:
        bt = batch // 2
    return bt, tk, s_pad


# --------------------------------------------------------------------------
# Parameter preparation (hoisted out of the per-call path)
# --------------------------------------------------------------------------
def prepare_params(params, *, matmul_dtype=jnp.bfloat16):
    """Pad / stack / cast the Q,K,V weights once per parameter set."""
    wq, bq = params["wq"], params["bq"]
    wk, bk = params["wk"], params["bk"]
    wv, bv = params["wv"], params["bv"]
    dim_in = wq.shape[0]
    dim_q, dim_k = wq.shape[1], wk.shape[1]
    if dim_q != dim_k:
        # torch's q.bmm(k.transpose(1, 2)) also requires dim_q == dim_k.
        raise ValueError("AttentionHead requires dim_q == dim_k")

    d_in_pad = _round_up(dim_in, LANE)
    p_pad = _round_up(max(dim_q, dim_k), LANE)
    w_dtype = jnp.dtype(matmul_dtype) if matmul_dtype is not None else jnp.dtype(jnp.float32)

    def pad_w(w):
        out = jnp.zeros((d_in_pad, p_pad), w_dtype)
        return out.at[:dim_in, : w.shape[1]].set(w.astype(w_dtype))

    def pad_b(b):
        b = jnp.asarray(b).reshape(1, -1)
        out = jnp.zeros((1, p_pad), jnp.float32)     # bias add stays in f32
        return out.at[:, : b.shape[1]].set(b.astype(jnp.float32))

    return {
        "w_all": jnp.stack([pad_w(wq), pad_w(wk), pad_w(wv)]),   # (3, Din_p, P)
        "b_all": jnp.stack([pad_b(bq), pad_b(bk), pad_b(bv)]),   # (3, 1, P)
        "dim_in": dim_in, "dim_q": dim_q, "dim_k": dim_k,
        "d_in_pad": d_in_pad, "p_pad": p_pad,
        "matmul_dtype": matmul_dtype,
    }


# --------------------------------------------------------------------------
# Wrapper
# --------------------------------------------------------------------------
def attention_head(query, key, value, params, *, matmul_dtype=jnp.bfloat16,
                   approx_reciprocal=True, batch_block=None, kv_block=None):
    """query/key/value: [B, S, dim_in]. Returns [B, S, dim_k].

    `params` is either the raw {"wq","bq",...} dict or prepare_params(...)
    output (preferred: padding/stacking/casting then runs once, not per call).
    """
    if "w_all" not in params:
        params = prepare_params(params, matmul_dtype=matmul_dtype)
    matmul_dtype = params["matmul_dtype"]

    w_all, b_all = params["w_all"], params["b_all"]
    dim_in, dim_q, dim_k = params["dim_in"], params["dim_q"], params["dim_k"]
    d_in_pad, p_pad = params["d_in_pad"], params["p_pad"]

    B, S, D = query.shape
    if D != dim_in:
        raise ValueError(f"feature dim {D} != dim_in {dim_in}")

    out_dtype = query.dtype
    in_dtype = jnp.dtype(matmul_dtype) if matmul_dtype is not None else jnp.dtype(jnp.float32)
    compute_dtype = in_dtype

    vmem_limit, budget = _vmem_limits()
    acct = dict(d_in_pad=d_in_pad, p_pad=p_pad, dim_k=dim_k,
                in_item=in_dtype.itemsize, w_item=jnp.dtype(w_all.dtype).itemsize,
                c_item=in_dtype.itemsize, single_buffer_weights=False)
    bt, tk, s_pad = _plan_tiles(B, S, budget_bytes=budget, **acct)
    if batch_block is not None:
        bt = batch_block
    if kv_block is not None:
        tk = kv_block
        s_pad = _round_up(S, tk)
    if B % bt:
        raise ValueError(f"batch block {bt} must divide batch {B}")
    if s_pad % tk or tk % _SUBLANE:
        raise ValueError(f"kv block {tk} must be a multiple of 8 dividing {s_pad}")

    def prep(x):
        x = x.astype(in_dtype)
        pad_s, pad_d = s_pad - S, d_in_pad - dim_in
        if pad_s or pad_d:
            x = jnp.pad(x, ((0, 0), (0, pad_s), (0, pad_d)))
        return x

    q_in, k_in, v_in = prep(query), prep(key), prep(value)

    inv_scale = 1.0 / (float(dim_q) ** 0.5)
    kernel = functools.partial(_attention_head_kernel, inv_scale, S,
                               approx_reciprocal)

    def build(core_parallel, single_buffer_weights):
        wb_kwargs = ({"pipeline_mode": pl.Buffered(1)}
                     if single_buffer_weights else {})
        sem0 = pltpu.CORE_PARALLEL if core_parallel else pltpu.PARALLEL
        return pl.pallas_call(
            kernel,
            out_shape=jax.ShapeDtypeStruct((B, s_pad, dim_k), out_dtype),
            grid_spec=pltpu.PrefetchScalarGridSpec(
                num_scalar_prefetch=0,
                grid=(B // bt, s_pad // tk),
                in_specs=[
                    pl.BlockSpec((bt, s_pad, d_in_pad), lambda b, k: (b, 0, 0)),
                    pl.BlockSpec((bt, tk, d_in_pad), lambda b, k: (b, k, 0)),
                    pl.BlockSpec((bt, tk, d_in_pad), lambda b, k: (b, k, 0)),
                    pl.BlockSpec((3, d_in_pad, p_pad), lambda b, k: (0, 0, 0),
                                 **wb_kwargs),
                    pl.BlockSpec((3, 1, p_pad), lambda b, k: (0, 0, 0),
                                 **wb_kwargs),
                ],
                out_specs=pl.BlockSpec((bt, s_pad, dim_k), lambda b, k: (b, 0, 0)),
                scratch_shapes=[
                    pltpu.VMEM((bt, s_pad, p_pad), compute_dtype),  # projected q
                    pltpu.VMEM((bt, s_pad, 1), jnp.float32),        # running max
                    pltpu.VMEM((bt, s_pad, 1), jnp.float32),        # running denom
                    pltpu.VMEM((bt, s_pad, p_pad), jnp.float32),    # accumulator
                ]),
            compiler_params=pltpu.CompilerParams(
                dimension_semantics=(sem0, pltpu.ARBITRARY),
                vmem_limit_bytes=vmem_limit),
        )

    # Try the aggressive config first (single-buffered weights + CORE_PARALLEL
    # for the v7x second TensorCore); fall back to plain double-buffered /
    # PARALLEL if this jax/Mosaic build rejects either feature.
    last_exc = None
    for aggressive in (True, False):
        try:
            out = build(aggressive, aggressive)(q_in, k_in, v_in, w_all, b_all)
            out = jax.block_until_ready(out)   # surface lowering errors here
            break
        except Exception as exc:               # noqa: BLE001 - fallback path
            last_exc = exc
    else:
        raise last_exc

    return out if s_pad == S else out[:, :S, :]


# --------------------------------------------------------------------------
# Reference / init / demo
# --------------------------------------------------------------------------
def init_params(key, dim_in, dim_q, dim_k):
    """Deterministic init mimicking nn.Linear's uniform(-1/sqrt(fan_in), +)."""
    ks = jax.random.split(key, 6)
    bound = 1.0 / (dim_in ** 0.5)
    u = lambda k, shape: jax.random.uniform(k, shape, jnp.float32, -bound, bound)
    return {
        "wq": u(ks[0], (dim_in, dim_q)), "bq": u(ks[1], (1, dim_q)),
        "wk": u(ks[2], (dim_in, dim_k)), "bk": u(ks[3], (1, dim_k)),
        "wv": u(ks[4], (dim_in, dim_k)), "bv": u(ks[5], (1, dim_k)),
    }


def _reference(query, key, value, params):
    q = query @ params["wq"] + params["bq"]
    k = key @ params["wk"] + params["bk"]
    v = value @ params["wv"] + params["bv"]
    scores = jnp.einsum("bqd,bkd->bqk", q, k) / (q.shape[-1] ** 0.5)
    return jnp.einsum("bqk,bkd->bqd", jax.nn.softmax(scores, axis=-1), v)


if __name__ == "__main__":
    B, S, dim_in, dim_q, dim_k = 2, 8, 32, 16, 16

    root = jax.random.PRNGKey(0)
    kp, kq, kk, kvr = jax.random.split(root, 4)
    params = init_params(kp, dim_in, dim_q, dim_k)

    query = jax.random.normal(kq, (B, S, dim_in), jnp.float32)
    key_t = jax.random.normal(kk, (B, S, dim_in), jnp.float32)
    value = jax.random.normal(kvr, (B, S, dim_in), jnp.float32)

    ref = _reference(query, key_t, value, params)

    # Fast default path: bf16 MXU operands, f32 accumulation + softmax.
    prepared = prepare_params(params)                  # hoisted pad/stack/cast
    out = attention_head(query, key_t, value, prepared)
    out = jax.block_until_ready(out)
    assert out.shape == (B, S, dim_k)
    assert jnp.allclose(out, ref, atol=6e-2, rtol=6e-2)

    # Parity path: f32 matmuls, exact softmax divide.
    out_exact = attention_head(query, key_t, value, params,
                               matmul_dtype=None, approx_reciprocal=False)
    out_exact = jax.block_until_ready(out_exact)
    assert jnp.allclose(out_exact, ref, atol=2e-3, rtol=2e-3)

    print("KERNEL_OK")
</pallas_src>

<mosaic_0001>
module attributes {stable_mosaic.version = 11 : i64} {
  func.func @_attention_head_kernel(%arg0: i32, %arg1: i32, %arg2: memref<1x8x128xbf16, #tpu.memory_space<vmem>>, %arg3: memref<1x8x128xbf16, #tpu.memory_space<vmem>>, %arg4: memref<1x8x128xbf16, #tpu.memory_space<vmem>>, %arg5: memref<3x128x128xbf16, #tpu.memory_space<vmem>>, %arg6: memref<3x1x128xf32, #tpu.memory_space<vmem>>, %arg7: memref<1x8x16xf32, #tpu.memory_space<vmem>>, %arg8: memref<1x8x128xbf16, #tpu.memory_space<vmem>>, %arg9: memref<1x8x1xf32, #tpu.memory_space<vmem>>, %arg10: memref<1x8x1xf32, #tpu.memory_space<vmem>>, %arg11: memref<1x8x128xf32, #tpu.memory_space<vmem>>) attributes {dimension_semantics = [#tpu.dimension_semantics<core_parallel>, #tpu.dimension_semantics<arbitrary>], iteration_bounds = array<i64: 2, 1>, scalar_prefetch = 0 : i64, scratch_operands = 4 : i64, tpu.core_type = #tpu.core_type<tc>, window_params = [{transform_indices = @transform_0, window_bounds = array<i64: 1, 8, 128>}, {transform_indices = @transform_1, window_bounds = array<i64: 1, 8, 128>}, {transform_indices = @transform_2, window_bounds = array<i64: 1, 8, 128>}, {pipeline_mode = #tpu.pipeline_mode<synchronous>, transform_indices = @transform_3, window_bounds = array<i64: 3, 128, 128>}, {pipeline_mode = #tpu.pipeline_mode<synchronous>, transform_indices = @transform_4, window_bounds = array<i64: 3, 1, 128>}, {transform_indices = @transform_5, window_bounds = array<i64: 1, 8, 16>}]} {
    %c0_i32 = arith.constant 0 : i32
    %0 = arith.cmpi eq, %arg1, %c0_i32 : i32
    %1 = arith.extui %0 : i1 to i32
    %c0_i32_0 = arith.constant 0 : i32
    %2 = arith.cmpi ne, %1, %c0_i32_0 : i32
    scf.if %2 {
      %c0_44 = arith.constant 0 : index
      %c0_45 = arith.constant 0 : index
      %c0_46 = arith.constant 0 : index
      %53 = vector.load %arg2[%c0_44, %c0_45, %c0_46] : memref<1x8x128xbf16, #tpu.memory_space<vmem>>, vector<1x8x128xbf16>
      %54 = vector.shape_cast %53 : vector<1x8x128xbf16> to vector<8x128xbf16>
      %c0_47 = arith.constant 0 : index
      %c0_48 = arith.constant 0 : index
      %c0_49 = arith.constant 0 : index
      %55 = vector.load %arg5[%c0_47, %c0_48, %c0_49] : memref<3x128x128xbf16, #tpu.memory_space<vmem>>, vector<1x128x128xbf16>
      %56 = vector.shape_cast %55 : vector<1x128x128xbf16> to vector<128x128xbf16>
      %cst_50 = arith.constant dense<0.000000e+00> : vector<8x128xf32>
      %57 = tpu.matmul %54, %56, %cst_50 {dimension_numbers = #tpu.dot_dimension_numbers<[1], [0], [0], [1], [0, 0, 1, 1], [], []>} : vector<8x128xbf16>, vector<128x128xbf16>, vector<8x128xf32> -> vector<8x128xf32>
      %c0_51 = arith.constant 0 : index
      %c0_52 = arith.constant 0 : index
      %c0_53 = arith.constant 0 : index
      %58 = vector.load %arg6[%c0_51, %c0_52, %c0_53] : memref<3x1x128xf32, #tpu.memory_space<vmem>>, vector<1x1x128xf32>
      %59 = vector.shape_cast %58 : vector<1x1x128xf32> to vector<1x128xf32>
      %60 = vector.broadcast %59 : vector<1x128xf32> to vector<8x128xf32>
      %61 = arith.addf %57, %60 : vector<8x128xf32>
      %62 = vector.shape_cast %61 : vector<8x128xf32> to vector<1x8x128xf32>
      %cst_54 = arith.constant 2.500000e-01 : f32
      %63 = vector.broadcast %cst_54 : f32 to vector<1x8x128xf32>
      %64 = arith.mulf %62, %63 : vector<1x8x128xf32>
      %65 = arith.truncf %64 : vector<1x8x128xf32> to vector<1x8x128xbf16>
      %c0_55 = arith.constant 0 : index
      %c0_56 = arith.constant 0 : index
      %c0_57 = arith.constant 0 : index
      %66 = vector.load %arg8[%c0_55, %c0_56, %c0_57] : memref<1x8x128xbf16, #tpu.memory_space<vmem>>, vector<1x8x128xbf16>
      tpu.vector_store %arg8[%c0_55, %c0_56, %c0_57], %65 {strides = array<i32>} : memref<1x8x128xbf16, #tpu.memory_space<vmem>>, vector<1x8x128xbf16>,
      %cst_58 = arith.constant 0xFF800000 : f32
      %67 = vector.broadcast %cst_58 : f32 to vector<1x8x1xf32>
      %c0_59 = arith.constant 0 : index
      %c0_60 = arith.constant 0 : index
      %c0_61 = arith.constant 0 : index
      %68 = vector.load %arg9[%c0_59, %c0_60, %c0_61] : memref<1x8x1xf32, #tpu.memory_space<vmem>>, vector<1x8x1xf32>
      tpu.vector_store %arg9[%c0_59, %c0_60, %c0_61], %67 {strides = array<i32>} : memref<1x8x1xf32, #tpu.memory_space<vmem>>, vector<1x8x1xf32>,
      %cst_62 = arith.constant 0.000000e+00 : f32
      %69 = vector.broadcast %cst_62 : f32 to vector<1x8x1xf32>
      %c0_63 = arith.constant 0 : index
      %c0_64 = arith.constant 0 : index
      %c0_65 = arith.constant 0 : index
      %70 = vector.load %arg10[%c0_63, %c0_64, %c0_65] : memref<1x8x1xf32, #tpu.memory_space<vmem>>, vector<1x8x1xf32>
      tpu.vector_store %arg10[%c0_63, %c0_64, %c0_65], %69 {strides = array<i32>} : memref<1x8x1xf32, #tpu.memory_space<vmem>>, vector<1x8x1xf32>,
      %cst_66 = arith.constant 0.000000e+00 : f32
      %71 = vector.broadcast %cst_66 : f32 to vector<1x8x128xf32>
      %c0_67 = arith.constant 0 : index
      %c0_68 = arith.constant 0 : index
      %c0_69 = arith.constant 0 : index
      %72 = vector.load %arg11[%c0_67, %c0_68, %c0_69] : memref<1x8x128xf32, #tpu.memory_space<vmem>>, vector<1x8x128xf32>
      tpu.vector_store %arg11[%c0_67, %c0_68, %c0_69], %71 {strides = array<i32>} : memref<1x8x128xf32, #tpu.memory_space<vmem>>, vector<1x8x128xf32>,
    } else {
    }
    %c0 = arith.constant 0 : index
    %c0_1 = arith.constant 0 : index
    %c0_2 = arith.constant 0 : index
    %3 = vector.load %arg3[%c0, %c0_1, %c0_2] : memref<1x8x128xbf16, #tpu.memory_space<vmem>>, vector<1x8x128xbf16>
    %4 = vector.shape_cast %3 : vector<1x8x128xbf16> to vector<8x128xbf16>
    %c1 = arith.constant 1 : index
    %c0_3 = arith.constant 0 : index
    %c0_4 = arith.constant 0 : index
    %5 = vector.load %arg5[%c1, %c0_3, %c0_4] : memref<3x128x128xbf16, #tpu.memory_space<vmem>>, vector<1x128x128xbf16>
    %6 = vector.shape_cast %5 : vector<1x128x128xbf16> to vector<128x128xbf16>
    %cst = arith.constant dense<0.000000e+00> : vector<8x128xf32>
    %7 = tpu.matmul %4, %6, %cst {dimension_numbers = #tpu.dot_dimension_numbers<[1], [0], [0], [1], [0, 0, 1, 1], [], []>} : vector<8x128xbf16>, vector<128x128xbf16>, vector<8x128xf32> -> vector<8x128xf32>
    %c1_5 = arith.constant 1 : index
    %c0_6 = arith.constant 0 : index
    %c0_7 = arith.constant 0 : index
    %8 = vector.load %arg6[%c1_5, %c0_6, %c0_7] : memref<3x1x128xf32, #tpu.memory_space<vmem>>, vector<1x1x128xf32>
    %9 = vector.shape_cast %8 : vector<1x1x128xf32> to vector<1x128xf32>
    %10 = vector.broadcast %9 : vector<1x128xf32> to vector<8x128xf32>
    %11 = arith.addf %7, %10 : vector<8x128xf32>
    %12 = vector.shape_cast %11 : vector<8x128xf32> to vector<1x8x128xf32>
    %c0_8 = arith.constant 0 : index
    %c0_9 = arith.constant 0 : index
    %c0_10 = arith.constant 0 : index
    %13 = vector.load %arg4[%c0_8, %c0_9, %c0_10] : memref<1x8x128xbf16, #tpu.memory_space<vmem>>, vector<1x8x128xbf16>
    %14 = vector.shape_cast %13 : vector<1x8x128xbf16> to vector<8x128xbf16>
    %c2 = arith.constant 2 : index
    %c0_11 = arith.constant 0 : index
    %c0_12 = arith.constant 0 : index
    %15 = vector.load %arg5[%c2, %c0_11, %c0_12] : memref<3x128x128xbf16, #tpu.memory_space<vmem>>, vector<1x128x128xbf16>
    %16 = vector.shape_cast %15 : vector<1x128x128xbf16> to vector<128x128xbf16>
    %cst_13 = arith.constant dense<0.000000e+00> : vector<8x128xf32>
    %17 = tpu.matmul %14, %16, %cst_13 {dimension_numbers = #tpu.dot_dimension_numbers<[1], [0], [0], [1], [0, 0, 1, 1], [], []>} : vector<8x128xbf16>, vector<128x128xbf16>, vector<8x128xf32> -> vector<8x128xf32>
    %c2_14 = arith.constant 2 : index
    %c0_15 = arith.constant 0 : index
    %c0_16 = arith.constant 0 : index
    %18 = vector.load %arg6[%c2_14, %c0_15, %c0_16] : memref<3x1x128xf32, #tpu.memory_space<vmem>>, vector<1x1x128xf32>
    %19 = vector.shape_cast %18 : vector<1x1x128xf32> to vector<1x128xf32>
    %20 = vector.broadcast %19 : vector<1x128xf32> to vector<8x128xf32>
    %21 = arith.addf %17, %20 : vector<8x128xf32>
    %22 = vector.shape_cast %21 : vector<8x128xf32> to vector<1x8x128xf32>
    %c0_17 = arith.constant 0 : index
    %c0_18 = arith.constant 0 : index
    %c0_19 = arith.constant 0 : index
    %23 = vector.load %arg8[%c0_17, %c0_18, %c0_19] : memref<1x8x128xbf16, #tpu.memory_space<vmem>>, vector<1x8x128xbf16>
    %24 = arith.truncf %12 : vector<1x8x128xf32> to vector<1x8x128xbf16>
    "tpu.trace_start"() <{level = 10 : i32, message = "bqd,bkd->bqk"}> : () -> ()
    %cst_20 = arith.constant dense<0.000000e+00> : vector<1x8x8xf32>
    %25 = tpu.matmul %23, %24, %cst_20 {dimension_numbers = #tpu.dot_dimension_numbers<[2], [2], [1], [1], [0, 0, 0, 1, 1, 1], [0], [0]>} : vector<1x8x128xbf16>, vector<1x8x128xbf16>, vector<1x8x8xf32> -> vector<1x8x8xf32>
    "tpu.trace_stop"() : () -> ()
    %c0_21 = arith.constant 0 : index
    %c0_22 = arith.constant 0 : index
    %c0_23 = arith.constant 0 : index
    %26 = vector.load %arg9[%c0_21, %c0_22, %c0_23] : memref<1x8x1xf32, #tpu.memory_space<vmem>>, vector<1x8x1xf32>
    %cst_24 = arith.constant dense<0xFF800000> : vector<1x8xf32>
    %27 = vector.multi_reduction <maximumf>, %25, %cst_24 [2] : vector<1x8x8xf32> to vector<1x8xf32>
    %28 = vector.shape_cast %27 : vector<1x8xf32> to vector<1x8x1xf32>
    %29 = arith.maximumf %26, %28 : vector<1x8x1xf32>
    %30 = arith.subf %26, %29 : vector<1x8x1xf32>
    %31 = math.exp %30 : vector<1x8x1xf32>
    %32 = vector.broadcast %29 : vector<1x8x1xf32> to vector<1x8x8xf32>
    %33 = arith.subf %25, %32 : vector<1x8x8xf32>
    %34 = math.exp %33 : vector<1x8x8xf32>
    %c0_25 = arith.constant 0 : index
    %c0_26 = arith.constant 0 : index
    %c0_27 = arith.constant 0 : index
    %35 = vector.load %arg10[%c0_25, %c0_26, %c0_27] : memref<1x8x1xf32, #tpu.memory_space<vmem>>, vector<1x8x1xf32>
    %36 = arith.mulf %31, %35 : vector<1x8x1xf32>
    %cst_28 = arith.constant dense<0.000000e+00> : vector<1x8xf32>
    %37 = vector.multi_reduction <add>, %34, %cst_28 [2] : vector<1x8x8xf32> to vector<1x8xf32>
    %38 = vector.shape_cast %37 : vector<1x8xf32> to vector<1x8x1xf32>
    %39 = arith.addf %36, %38 : vector<1x8x1xf32>
    %c0_29 = arith.constant 0 : index
    %c0_30 = arith.constant 0 : index
    %c0_31 = arith.constant 0 : index
    %40 = vector.load %arg10[%c0_29, %c0_30, %c0_31] : memref<1x8x1xf32, #tpu.memory_space<vmem>>, vector<1x8x1xf32>
    tpu.vector_store %arg10[%c0_29, %c0_30, %c0_31], %39 {strides = array<i32>} : memref<1x8x1xf32, #tpu.memory_space<vmem>>, vector<1x8x1xf32>,
    %c0_32 = arith.constant 0 : index
    %c0_33 = arith.constant 0 : index
    %c0_34 = arith.constant 0 : index
    %41 = vector.load %arg11[%c0_32, %c0_33, %c0_34] : memref<1x8x128xf32, #tpu.memory_space<vmem>>, vector<1x8x128xf32>
    %42 = vector.broadcast %31 : vector<1x8x1xf32> to vector<1x8x128xf32>
    %43 = arith.mulf %42, %41 : vector<1x8x128xf32>
    %44 = arith.truncf %34 : vector<1x8x8xf32> to vector<1x8x8xbf16>
    %45 = arith.truncf %22 : vector<1x8x128xf32> to vector<1x8x128xbf16>
    "tpu.trace_start"() <{level = 10 : i32, message = "bqk,bkd->bqd"}> : () -> ()
    %cst_35 = arith.constant dense<0.000000e+00> : vector<1x8x128xf32>
    %46 = tpu.matmul %44, %45, %cst_35 {dimension_numbers = #tpu.dot_dimension_numbers<[2], [1], [1], [2], [0, 0, 0, 1, 1, 2], [0], [0]>} : vector<1x8x8xbf16>, vector<1x8x128xbf16>, vector<1x8x128xf32> -> vector<1x8x128xf32>
    "tpu.trace_stop"() : () -> ()
    %47 = arith.addf %43, %46 : vector<1x8x128xf32>
    %c0_36 = arith.constant 0 : index
    %c0_37 = arith.constant 0 : index
    %c0_38 = arith.constant 0 : index
    %48 = vector.load %arg11[%c0_36, %c0_37, %c0_38] : memref<1x8x128xf32, #tpu.memory_space<vmem>>, vector<1x8x128xf32>
    tpu.vector_store %arg11[%c0_36, %c0_37, %c0_38], %47 {strides = array<i32>} : memref<1x8x128xf32, #tpu.memory_space<vmem>>, vector<1x8x128xf32>,
    %c0_39 = arith.constant 0 : index
    %c0_40 = arith.constant 0 : index
    %c0_41 = arith.constant 0 : index
    %49 = vector.load %arg9[%c0_39, %c0_40, %c0_41] : memref<1x8x1xf32, #tpu.memory_space<vmem>>, vector<1x8x1xf32>
    tpu.vector_store %arg9[%c0_39, %c0_40, %c0_41], %29 {strides = array<i32>} : memref<1x8x1xf32, #tpu.memory_space<vmem>>, vector<1x8x1xf32>,
    %c0_i32_42 = arith.constant 0 : i32
    %50 = arith.cmpi eq, %arg1, %c0_i32_42 : i32
    %51 = arith.extui %50 : i1 to i32
    %c0_i32_43 = arith.constant 0 : i32
    %52 = arith.cmpi ne, %51, %c0_i32_43 : i32
    scf.if %52 {
      %c0_44 = arith.constant 0 : index
      %c0_45 = arith.constant 0 : index
      %c0_46 = arith.constant 0 : index
      %53 = vector.load %arg11[%c0_44, %c0_45, %c0_46] : memref<1x8x128xf32, #tpu.memory_space<vmem>>, vector<1x8x128xf32>
      %c0_47 = arith.constant 0 : index
      %c0_48 = arith.constant 0 : index
      %c0_49 = arith.constant 0 : index
      %54 = vector.load %arg10[%c0_47, %c0_48, %c0_49] : memref<1x8x1xf32, #tpu.memory_space<vmem>>, vector<1x8x1xf32>
      %55 = tpu.reciprocal %54 {approx = true} : vector<1x8x1xf32> -> vector<1x8x1xf32>
      %56 = vector.broadcast %55 : vector<1x8x1xf32> to vector<1x8x128xf32>
      %57 = arith.mulf %53, %56 : vector<1x8x128xf32>
      %58 = vector.extract_strided_slice %57 {offsets = [0, 0, 0], sizes = [1, 8, 16], strides = [1, 1, 1]} : vector<1x8x128xf32> to vector<1x8x16xf32>
      %c0_50 = arith.constant 0 : index
      %c0_51 = arith.constant 0 : index
      %c0_52 = arith.constant 0 : index
      %59 = vector.load %arg7[%c0_50, %c0_51, %c0_52] : memref<1x8x16xf32, #tpu.memory_space<vmem>>, vector<1x8x16xf32>
      tpu.vector_store %arg7[%c0_50, %c0_51, %c0_52], %58 {strides = array<i32>} : memref<1x8x16xf32, #tpu.memory_space<vmem>>, vector<1x8x16xf32>,
    } else {
    }
    return
  }
  func.func @transform_0(%arg0: i32, %arg1: i32) -> (i32, i32, i32) {
    %c0_i32 = arith.constant 0 : i32
    %c0_i32_0 = arith.constant 0 : i32
    %c0_i32_1 = arith.constant 0 : i32
    return %arg0, %c0_i32, %c0_i32_0 : i32, i32, i32
  }
  func.func @transform_1(%arg0: i32, %arg1: i32) -> (i32, i32, i32) {
    %c0_i32 = arith.constant 0 : i32
    %c0_i32_0 = arith.constant 0 : i32
    return %arg0, %arg1, %c0_i32 : i32, i32, i32
  }
  func.func @transform_2(%arg0: i32, %arg1: i32) -> (i32, i32, i32) {
    %c0_i32 = arith.constant 0 : i32
    %c0_i32_0 = arith.constant 0 : i32
    return %arg0, %arg1, %c0_i32 : i32, i32, i32
  }
  func.func @transform_3(%arg0: i32, %arg1: i32) -> (i32, i32, i32) {
    %c0_i32 = arith.constant 0 : i32
    %c0_i32_0 = arith.constant 0 : i32
    %c0_i32_1 = arith.constant 0 : i32
    %c0_i32_2 = arith.constant 0 : i32
    return %c0_i32, %c0_i32_0, %c0_i32_1 : i32, i32, i32
  }
  func.func @transform_4(%arg0: i32, %arg1: i32) -> (i32, i32, i32) {
    %c0_i32 = arith.constant 0 : i32
    %c0_i32_0 = arith.constant 0 : i32
    %c0_i32_1 = arith.constant 0 : i32
    %c0_i32_2 = arith.constant 0 : i32
    return %c0_i32, %c0_i32_0, %c0_i32_1 : i32, i32, i32
  }
  func.func @transform_5(%arg0: i32, %arg1: i32) -> (i32, i32, i32) {
    %c0_i32 = arith.constant 0 : i32
    %c0_i32_0 = arith.constant 0 : i32
    %c0_i32_1 = arith.constant 0 : i32
    return %arg0, %c0_i32, %c0_i32_0 : i32, i32, i32
  }
}

module attributes {stable_mosaic.version = 11 : i64} {
  func.func @_attention_head_kernel(%arg0: i32, %arg1: i32, %arg2: memref<1x8x128xbf16, #tpu.memory_space<vmem>>, %arg3: memref<1x8x128xbf16, #tpu.memory_space<vmem>>, %arg4: memref<1x8x128xbf16, #tpu.memory_space<vmem>>, %arg5: memref<3x128x128xbf16, #tpu.memory_space<vmem>>, %arg6: memref<3x1x128xf32, #tpu.memory_space<vmem>>, %arg7: memref<1x8x16xf32, #tpu.memory_space<vmem>>, %arg8: memref<1x8x128xbf16, #tpu.memory_space<vmem>>, %arg9: memref<1x8x1xf32, #tpu.memory_space<vmem>>, %arg10: memref<1x8x1xf32, #tpu.memory_space<vmem>>, %arg11: memref<1x8x128xf32, #tpu.memory_space<vmem>>) attributes {dimension_semantics = [#tpu.dimension_semantics<parallel>, #tpu.dimension_semantics<arbitrary>], iteration_bounds = array<i64: 2, 1>, scalar_prefetch = 0 : i64, scratch_operands = 4 : i64, tpu.core_type = #tpu.core_type<tc>, window_params = [{transform_indices = @transform_0, window_bounds = array<i64: 1, 8, 128>}, {transform_indices = @transform_1, window_bounds = array<i64: 1, 8, 128>}, {transform_indices = @transform_2, window_bounds = array<i64: 1, 8, 128>}, {pipeline_mode = #tpu.pipeline_mode<synchronous>, transform_indices = @transform_3, window_bounds = array<i64: 3, 128, 128>}, {pipeline_mode = #tpu.pipeline_mode<synchronous>, transform_indices = @transform_4, window_bounds = array<i64: 3, 1, 128>}, {transform_indices = @transform_5, window_bounds = array<i64: 1, 8, 16>}]} {
    %c0_i32 = arith.constant 0 : i32
    %0 = arith.cmpi eq, %arg1, %c0_i32 : i32
    %1 = arith.extui %0 : i1 to i32
    %c0_i32_0 = arith.constant 0 : i32
    %2 = arith.cmpi ne, %1, %c0_i32_0 : i32
    scf.if %2 {
      %c0_44 = arith.constant 0 : index
      %c0_45 = arith.constant 0 : index
      %c0_46 = arith.constant 0 : index
      %53 = vector.load %arg2[%c0_44, %c0_45, %c0_46] : memref<1x8x128xbf16, #tpu.memory_space<vmem>>, vector<1x8x128xbf16>
      %54 = vector.shape_cast %53 : vector<1x8x128xbf16> to vector<8x128xbf16>
      %c0_47 = arith.constant 0 : index
      %c0_48 = arith.constant 0 : index
      %c0_49 = arith.constant 0 : index
      %55 = vector.load %arg5[%c0_47, %c0_48, %c0_49] : memref<3x128x128xbf16, #tpu.memory_space<vmem>>, vector<1x128x128xbf16>
      %56 = vector.shape_cast %55 : vector<1x128x128xbf16> to vector<128x128xbf16>
      %cst_50 = arith.constant dense<0.000000e+00> : vector<8x128xf32>
      %57 = tpu.matmul %54, %56, %cst_50 {dimension_numbers = #tpu.dot_dimension_numbers<[1], [0], [0], [1], [0, 0, 1, 1], [], []>} : vector<8x128xbf16>, vector<128x128xbf16>, vector<8x128xf32> -> vector<8x128xf32>
      %c0_51 = arith.constant 0 : index
      %c0_52 = arith.constant 0 : index
      %c0_53 = arith.constant 0 : index
      %58 = vector.load %arg6[%c0_51, %c0_52, %c0_53] : memref<3x1x128xf32, #tpu.memory_space<vmem>>, vector<1x1x128xf32>
      %59 = vector.shape_cast %58 : vector<1x1x128xf32> to vector<1x128xf32>
      %60 = vector.broadcast %59 : vector<1x128xf32> to vector<8x128xf32>
      %61 = arith.addf %57, %60 : vector<8x128xf32>
      %62 = vector.shape_cast %61 : vector<8x128xf32> to vector<1x8x128xf32>
      %cst_54 = arith.constant 2.500000e-01 : f32
      %63 = vector.broadcast %cst_54 : f32 to vector<1x8x128xf32>
      %64 = arith.mulf %62, %63 : vector<1x8x128xf32>
      %65 = arith.truncf %64 : vector<1x8x128xf32> to vector<1x8x128xbf16>
      %c0_55 = arith.constant 0 : index
      %c0_56 = arith.constant 0 : index
      %c0_57 = arith.constant 0 : index
      %66 = vector.load %arg8[%c0_55, %c0_56, %c0_57] : memref<1x8x128xbf16, #tpu.memory_space<vmem>>, vector<1x8x128xbf16>
      tpu.vector_store %arg8[%c0_55, %c0_56, %c0_57], %65 {strides = array<i32>} : memref<1x8x128xbf16, #tpu.memory_space<vmem>>, vector<1x8x128xbf16>,
      %cst_58 = arith.constant 0xFF800000 : f32
      %67 = vector.broadcast %cst_58 : f32 to vector<1x8x1xf32>
      %c0_59 = arith.constant 0 : index
      %c0_60 = arith.constant 0 : index
      %c0_61 = arith.constant 0 : index
      %68 = vector.load %arg9[%c0_59, %c0_60, %c0_61] : memref<1x8x1xf32, #tpu.memory_space<vmem>>, vector<1x8x1xf32>
      tpu.vector_store %arg9[%c0_59, %c0_60, %c0_61], %67 {strides = array<i32>} : memref<1x8x1xf32, #tpu.memory_space<vmem>>, vector<1x8x1xf32>,
      %cst_62 = arith.constant 0.000000e+00 : f32
      %69 = vector.broadcast %cst_62 : f32 to vector<1x8x1xf32>
      %c0_63 = arith.constant 0 : index
      %c0_64 = arith.constant 0 : index
      %c0_65 = arith.constant 0 : index
      %70 = vector.load %arg10[%c0_63, %c0_64, %c0_65] : memref<1x8x1xf32, #tpu.memory_space<vmem>>, vector<1x8x1xf32>
      tpu.vector_store %arg10[%c0_63, %c0_64, %c0_65], %69 {strides = array<i32>} : memref<1x8x1xf32, #tpu.memory_space<vmem>>, vector<1x8x1xf32>,
      %cst_66 = arith.constant 0.000000e+00 : f32
      %71 = vector.broadcast %cst_66 : f32 to vector<1x8x128xf32>
      %c0_67 = arith.constant 0 : index
      %c0_68 = arith.constant 0 : index
      %c0_69 = arith.constant 0 : index
      %72 = vector.load %arg11[%c0_67, %c0_68, %c0_69] : memref<1x8x128xf32, #tpu.memory_space<vmem>>, vector<1x8x128xf32>
      tpu.vector_store %arg11[%c0_67, %c0_68, %c0_69], %71 {strides = array<i32>} : memref<1x8x128xf32, #tpu.memory_space<vmem>>, vector<1x8x128xf32>,
    } else {
    }
    %c0 = arith.constant 0 : index
    %c0_1 = arith.constant 0 : index
    %c0_2 = arith.constant 0 : index
    %3 = vector.load %arg3[%c0, %c0_1, %c0_2] : memref<1x8x128xbf16, #tpu.memory_space<vmem>>, vector<1x8x128xbf16>
    %4 = vector.shape_cast %3 : vector<1x8x128xbf16> to vector<8x128xbf16>
    %c1 = arith.constant 1 : index
    %c0_3 = arith.constant 0 : index
    %c0_4 = arith.constant 0 : index
    %5 = vector.load %arg5[%c1, %c0_3, %c0_4] : memref<3x128x128xbf16, #tpu.memory_space<vmem>>, vector<1x128x128xbf16>
    %6 = vector.shape_cast %5 : vector<1x128x128xbf16> to vector<128x128xbf16>
    %cst = arith.constant dense<0.000000e+00> : vector<8x128xf32>
    %7 = tpu.matmul %4, %6, %cst {dimension_numbers = #tpu.dot_dimension_numbers<[1], [0], [0], [1], [0, 0, 1, 1], [], []>} : vector<8x128xbf16>, vector<128x128xbf16>, vector<8x128xf32> -> vector<8x128xf32>
    %c1_5 = arith.constant 1 : index
    %c0_6 = arith.constant 0 : index
    %c0_7 = arith.constant 0 : index
    %8 = vector.load %arg6[%c1_5, %c0_6, %c0_7] : memref<3x1x128xf32, #tpu.memory_space<vmem>>, vector<1x1x128xf32>
    %9 = vector.shape_cast %8 : vector<1x1x128xf32> to vector<1x128xf32>
    %10 = vector.broadcast %9 : vector<1x128xf32> to vector<8x128xf32>
    %11 = arith.addf %7, %10 : vector<8x128xf32>
    %12 = vector.shape_cast %11 : vector<8x128xf32> to vector<1x8x128xf32>
    %c0_8 = arith.constant 0 : index
    %c0_9 = arith.constant 0 : index
    %c0_10 = arith.constant 0 : index
    %13 = vector.load %arg4[%c0_8, %c0_9, %c0_10] : memref<1x8x128xbf16, #tpu.memory_space<vmem>>, vector<1x8x128xbf16>
    %14 = vector.shape_cast %13 : vector<1x8x128xbf16> to vector<8x128xbf16>
    %c2 = arith.constant 2 : index
    %c0_11 = arith.constant 0 : index
    %c0_12 = arith.constant 0 : index
    %15 = vector.load %arg5[%c2, %c0_11, %c0_12] : memref<3x128x128xbf16, #tpu.memory_space<vmem>>, vector<1x128x128xbf16>
    %16 = vector.shape_cast %15 : vector<1x128x128xbf16> to vector<128x128xbf16>
    %cst_13 = arith.constant dense<0.000000e+00> : vector<8x128xf32>
    %17 = tpu.matmul %14, %16, %cst_13 {dimension_numbers = #tpu.dot_dimension_numbers<[1], [0], [0], [1], [0, 0, 1, 1], [], []>} : vector<8x128xbf16>, vector<128x128xbf16>, vector<8x128xf32> -> vector<8x128xf32>
    %c2_14 = arith.constant 2 : index
    %c0_15 = arith.constant 0 : index
    %c0_16 = arith.constant 0 : index
    %18 = vector.load %arg6[%c2_14, %c0_15, %c0_16] : memref<3x1x128xf32, #tpu.memory_space<vmem>>, vector<1x1x128xf32>
    %19 = vector.shape_cast %18 : vector<1x1x128xf32> to vector<1x128xf32>
    %20 = vector.broadcast %19 : vector<1x128xf32> to vector<8x128xf32>
    %21 = arith.addf %17, %20 : vector<8x128xf32>
    %22 = vector.shape_cast %21 : vector<8x128xf32> to vector<1x8x128xf32>
    %c0_17 = arith.constant 0 : index
    %c0_18 = arith.constant 0 : index
    %c0_19 = arith.constant 0 : index
    %23 = vector.load %arg8[%c0_17, %c0_18, %c0_19] : memref<1x8x128xbf16, #tpu.memory_space<vmem>>, vector<1x8x128xbf16>
    %24 = arith.truncf %12 : vector<1x8x128xf32> to vector<1x8x128xbf16>
    "tpu.trace_start"() <{level = 10 : i32, message = "bqd,bkd->bqk"}> : () -> ()
    %cst_20 = arith.constant dense<0.000000e+00> : vector<1x8x8xf32>
    %25 = tpu.matmul %23, %24, %cst_20 {dimension_numbers = #tpu.dot_dimension_numbers<[2], [2], [1], [1], [0, 0, 0, 1, 1, 1], [0], [0]>} : vector<1x8x128xbf16>, vector<1x8x128xbf16>, vector<1x8x8xf32> -> vector<1x8x8xf32>
    "tpu.trace_stop"() : () -> ()
    %c0_21 = arith.constant 0 : index
    %c0_22 = arith.constant 0 : index
    %c0_23 = arith.constant 0 : index
    %26 = vector.load %arg9[%c0_21, %c0_22, %c0_23] : memref<1x8x1xf32, #tpu.memory_space<vmem>>, vector<1x8x1xf32>
    %cst_24 = arith.constant dense<0xFF800000> : vector<1x8xf32>
    %27 = vector.multi_reduction <maximumf>, %25, %cst_24 [2] : vector<1x8x8xf32> to vector<1x8xf32>
    %28 = vector.shape_cast %27 : vector<1x8xf32> to vector<1x8x1xf32>
    %29 = arith.maximumf %26, %28 : vector<1x8x1xf32>
    %30 = arith.subf %26, %29 : vector<1x8x1xf32>
    %31 = math.exp %30 : vector<1x8x1xf32>
    %32 = vector.broadcast %29 : vector<1x8x1xf32> to vector<1x8x8xf32>
    %33 = arith.subf %25, %32 : vector<1x8x8xf32>
    %34 = math.exp %33 : vector<1x8x8xf32>
    %c0_25 = arith.constant 0 : index
    %c0_26 = arith.constant 0 : index
    %c0_27 = arith.constant 0 : index
    %35 = vector.load %arg10[%c0_25, %c0_26, %c0_27] : memref<1x8x1xf32, #tpu.memory_space<vmem>>, vector<1x8x1xf32>
    %36 = arith.mulf %31, %35 : vector<1x8x1xf32>
    %cst_28 = arith.constant dense<0.000000e+00> : vector<1x8xf32>
    %37 = vector.multi_reduction <add>, %34, %cst_28 [2] : vector<1x8x8xf32> to vector<1x8xf32>
    %38 = vector.shape_cast %37 : vector<1x8xf32> to vector<1x8x1xf32>
    %39 = arith.addf %36, %38 : vector<1x8x1xf32>
    %c0_29 = arith.constant 0 : index
    %c0_30 = arith.constant 0 : index
    %c0_31 = arith.constant 0 : index
    %40 = vector.load %arg10[%c0_29, %c0_30, %c0_31] : memref<1x8x1xf32, #tpu.memory_space<vmem>>, vector<1x8x1xf32>
    tpu.vector_store %arg10[%c0_29, %c0_30, %c0_31], %39 {strides = array<i32>} : memref<1x8x1xf32, #tpu.memory_space<vmem>>, vector<1x8x1xf32>,
    %c0_32 = arith.constant 0 : index
    %c0_33 = arith.constant 0 : index
    %c0_34 = arith.constant 0 : index
    %41 = vector.load %arg11[%c0_32, %c0_33, %c0_34] : memref<1x8x128xf32, #tpu.memory_space<vmem>>, vector<1x8x128xf32>
    %42 = vector.broadcast %31 : vector<1x8x1xf32> to vector<1x8x128xf32>
    %43 = arith.mulf %42, %41 : vector<1x8x128xf32>
    %44 = arith.truncf %34 : vector<1x8x8xf32> to vector<1x8x8xbf16>
    %45 = arith.truncf %22 : vector<1x8x128xf32> to vector<1x8x128xbf16>
    "tpu.trace_start"() <{level = 10 : i32, message = "bqk,bkd->bqd"}> : () -> ()
    %cst_35 = arith.constant dense<0.000000e+00> : vector<1x8x128xf32>
    %46 = tpu.matmul %44, %45, %cst_35 {dimension_numbers = #tpu.dot_dimension_numbers<[2], [1], [1], [2], [0, 0, 0, 1, 1, 2], [0], [0]>} : vector<1x8x8xbf16>, vector<1x8x128xbf16>, vector<1x8x128xf32> -> vector<1x8x128xf32>
    "tpu.trace_stop"() : () -> ()
    %47 = arith.addf %43, %46 : vector<1x8x128xf32>
    %c0_36 = arith.constant 0 : index
    %c0_37 = arith.constant 0 : index
    %c0_38 = arith.constant 0 : index
    %48 = vector.load %arg11[%c0_36, %c0_37, %c0_38] : memref<1x8x128xf32, #tpu.memory_space<vmem>>, vector<1x8x128xf32>
    tpu.vector_store %arg11[%c0_36, %c0_37, %c0_38], %47 {strides = array<i32>} : memref<1x8x128xf32, #tpu.memory_space<vmem>>, vector<1x8x128xf32>,
    %c0_39 = arith.constant 0 : index
    %c0_40 = arith.constant 0 : index
    %c0_41 = arith.constant 0 : index
    %49 = vector.load %arg9[%c0_39, %c0_40, %c0_41] : memref<1x8x1xf32, #tpu.memory_space<vmem>>, vector<1x8x1xf32>
    tpu.vector_store %arg9[%c0_39, %c0_40, %c0_41], %29 {strides = array<i32>} : memref<1x8x1xf32, #tpu.memory_space<vmem>>, vector<1x8x1xf32>,
    %c0_i32_42 = arith.constant 0 : i32
    %50 = arith.cmpi eq, %arg1, %c0_i32_42 : i32
    %51 = arith.extui %50 : i1 to i32
    %c0_i32_43 = arith.constant 0 : i32
    %52 = arith.cmpi ne, %51, %c0_i32_43 : i32
    scf.if %52 {
      %c0_44 = arith.constant 0 : index
      %c0_45 = arith.constant 0 : index
      %c0_46 = arith.constant 0 : index
      %53 = vector.load %arg11[%c0_44, %c0_45, %c0_46] : memref<1x8x128xf32, #tpu.memory_space<vmem>>, vector<1x8x128xf32>
      %c0_47 = arith.constant 0 : index
      %c0_48 = arith.constant 0 : index
      %c0_49 = arith.constant 0 : index
      %54 = vector.load %arg10[%c0_47, %c0_48, %c0_49] : memref<1x8x1xf32, #tpu.memory_space<vmem>>, vector<1x8x1xf32>
      %55 = tpu.reciprocal %54 {approx = true} : vector<1x8x1xf32> -> vector<1x8x1xf32>
      %56 = vector.broadcast %55 : vector<1x8x1xf32> to vector<1x8x128xf32>
      %57 = arith.mulf %53, %56 : vector<1x8x128xf32>
      %58 = vector.extract_strided_slice %57 {offsets = [0, 0, 0], sizes = [1, 8, 16], strides = [1, 1, 1]} : vector<1x8x128xf32> to vector<1x8x16xf32>
      %c0_50 = arith.constant 0 : index
      %c0_51 = arith.constant 0 : index
      %c0_52 = arith.constant 0 : index
      %59 = vector.load %arg7[%c0_50, %c0_51, %c0_52] : memref<1x8x16xf32, #tpu.memory_space<vmem>>, vector<1x8x16xf32>
      tpu.vector_store %arg7[%c0_50, %c0_51, %c0_52], %58 {strides = array<i32>} : memref<1x8x16xf32, #tpu.memory_space<vmem>>, vector<1x8x16xf32>,
    } else {
    }
    return
  }
  func.func @transform_0(%arg0: i32, %arg1: i32) -> (i32, i32, i32) {
    %c0_i32 = arith.constant 0 : i32
    %c0_i32_0 = arith.constant 0 : i32
    %c0_i32_1 = arith.constant 0 : i32
    return %arg0, %c0_i32, %c0_i32_0 : i32, i32, i32
  }
  func.func @transform_1(%arg0: i32, %arg1: i32) -> (i32, i32, i32) {
    %c0_i32 = arith.constant 0 : i32
    %c0_i32_0 = arith.constant 0 : i32
    return %arg0, %arg1, %c0_i32 : i32, i32, i32
  }
  func.func @transform_2(%arg0: i32, %arg1: i32) -> (i32, i32, i32) {
    %c0_i32 = arith.constant 0 : i32
    %c0_i32_0 = arith.constant 0 : i32
    return %arg0, %arg1, %c0_i32 : i32, i32, i32
  }
  func.func @transform_3(%arg0: i32, %arg1: i32) -> (i32, i32, i32) {
    %c0_i32 = arith.constant 0 : i32
    %c0_i32_0 = arith.constant 0 : i32
    %c0_i32_1 = arith.constant 0 : i32
    %c0_i32_2 = arith.constant 0 : i32
    return %c0_i32, %c0_i32_0, %c0_i32_1 : i32, i32, i32
  }
  func.func @transform_4(%arg0: i32, %arg1: i32) -> (i32, i32, i32) {
    %c0_i32 = arith.constant 0 : i32
    %c0_i32_0 = arith.constant 0 : i32
    %c0_i32_1 = arith.constant 0 : i32
    %c0_i32_2 = arith.constant 0 : i32
    return %c0_i32, %c0_i32_0, %c0_i32_1 : i32, i32, i32
  }
  func.func @transform_5(%arg0: i32, %arg1: i32) -> (i32, i32, i32) {
    %c0_i32 = arith.constant 0 : i32
    %c0_i32_0 = arith.constant 0 : i32
    %c0_i32_1 = arith.constant 0 : i32
    return %arg0, %c0_i32, %c0_i32_0 : i32, i32, i32
  }
}

</mosaic_0001>

<bundles_post_ra>
// kernel: tpu_custom_call.1
= control target key start
LH: loop header
LB: loop body
LE: loop exit
PB: predicated region body
PF: predicated region fallthrough
CT: control target
= control target key end

     0   :  { %s1779_s0 = inlined_call_operand.hbm [shape: bf16[2,8,128], index: 0, kind: input, shape index: {}]   ;;  %s1780_s1 = inlined_call_operand.hbm [shape: bf16[2,8,128], index: 1, kind: input, shape index: {}]   ;;  %s1781_s2 = inlined_call_operand.hbm [shape: bf16[2,8,128], index: 2, kind: input, shape index: {}]   ;;  %s1782_s3 = inlined_call_operand.hbm [shape: bf16[3,128,128], index: 3, kind: input, shape index: {}]   ;;  %s1783_s4 = inlined_call_operand.vmem [shape: f32[3,1,128], index: 4, kind: input, shape index: {}]   ;;  %s1784_s5 = inlined_call_operand.hbm [shape: f32[2,8,16], index: 5, kind: output, shape index: {}]  }
   0x1   :  { %1792 = sst [smem:[#allocation23_spill]] %s1780_s1 }
   0x2   :  { %10 = vsyncpa [#allocation7], 0 }
   0x3   :  { %12 = vsyncpa [#allocation7 + $0x1], 0 }
   0x4   :  { %13 = vsyncpa [#allocation10], 0 }
   0x5   :  { %15 = vsyncpa [#allocation10 + $0x1], 0 }
   0x6   :  { %16 = vsyncpa [#allocation13], 0 }
   0x7   :  { %17 = vsyncpa [#allocation8], 0 }
   0x8   :  { %19 = vsyncpa [#allocation8 + $0x1], 0  ;;  %s1499_s18 = smov 0   ;;  %s1501_s19 = smov 0  }
   0x9   :  { %s1503_s20 = smov 0   ;;  %s1505_s21 = smov 0  }
   0xa   :  { %s1507_s22 = smov 0   ;;  %s1509_s23 = smov 0  }
   0xb LB: > { %1793 = sst [smem:[#allocation19_spill]] %s1452_s22  ;;  %s37_s24 = sadd.s32 1, %s1452_s22  ;;  %s1456_s23 = sphi %s1509_s23, %s25_s23   ;;  %s1452_s22 = sphi %s1507_s22, %s1818_s22   ;;  %s1448_s21 = sphi %s1505_s21, %s1813_s21   ;;  %s1444_s20 = sphi %s1503_s20, %s1817_s20   ;;  %s1440_s19 = sphi %s1501_s19, %s1816_s19   ;;  %s1436_s18 = sphi %s1499_s18, %s1815_s18  }
   0xc   : > { %1794 = sst [smem:[#allocation20_spill]] %s1456_s23  ;;  %s44_s25 = sadd.s32 1, %s1444_s20 }
   0xd   : > { %p39_p0 = scmp.ge.s32.totalorder %s37_s24, 2  ;;  %p51_p1 = scmp.ne.s32.totalorder %s1444_s20, %s1440_s19 }
   0xe   : > { %p52_p2 = scmp.eq.s32.totalorder %s1456_s23, 0  ;;  %p1168_p5 = scmp.lt.s32.totalorder %s1456_s23, 2 }
   0xf   : > { %s1820_s24 = smov (%p39_p0, %s37_s24), 0  ;;  %s1785_s27 = sand.u32 1, %s1444_s20  }
  0x10   : > { %1795 = sst [smem:[#allocation21_spill]] %s1820_s24  ;;  %p53_p4 = por %p52_p2, %p51_p1 }
  0x11   : > { %s41_s26 = ssub.s32 %s1452_s22, %s1820_s24  ;;  %s1546_s28 = sshll.u32 %s1785_s27, 2 }
  0x12   : > { %p42_p6 = scmp.eq.s32.totalorder %s41_s26, 0  ;;  %s1549_s29 = sshll.u32 %s1452_s22, 6 }
  0x13   : > { %p1551_p7 = pnand %p1168_p5, %p53_p4  ;;  %s239_s7 = sand.u32 1, %s1456_s23  }
  0x14   : > { %s1556_s6 = scalar_select %p42_p6, %s1444_s20, %s44_s25  }
  0x15   : > { %s1798_s1 = sld [smem:[#allocation23_spill]]  ;;  %s243_s11 = scalar_lea.vmem [#allocation9], %s1546_s28 }
  0x16   : > { %1797 = sst [smem:[#allocation22_spill]] %s1556_s6  ;;  %s251_s12 = sshll.u32 %s243_s11, 4  ;;  %s252_s12 = int_to_ptr.vmem [resolvable:$true] %s251_s12 }
  0x17   : > { %s1564_s13 = scalar_lea.sflag [#allocation10], %s239_s7  ;;  %p1787_p8 = pneg %p1551_p7 }
  0x18   : > { %s1271_s14 = scalar_lea.vmem %s252_s12, 64  ;;  %s1458_s15 = smov [#allocation9]  }
  0x19   : > { %p1272_p9 = scmp.ne.s32.totalorder %s252_s12, %s1271_s14  ;;  %s1276_s16 = sshll.u32 %s1458_s15, 4  ;;  %s1277_s16 = int_to_ptr.vmem [resolvable:$false] %s1276_s16 }
  0x1a   : > { %s1278_s17 = scalar_lea.vmem %s1277_s16, 128  ;;  %p1279_p12 = scmp.lt.s32.totalorder %s252_s12, %s1277_s16 }
  0x1b   : > { %s249_s10 = scalar_lea.hbm %s1798_s1, %s1549_s29  ;;  %p1274_p10 = pnand %p1272_p9, %p1787_p8 }
  0x1c   : > { %p1280_p13 = scmp.lt.s32.totalorder %s1278_s17, %s1271_s14 }
  0x1d   : > { %p1275_p11 = pneg %p1274_p10 }
  0x1e   : > { %p1281_p0 = por %p1280_p13, %p1279_p12 }
  0x20   : > { %p1282_p2 = pnand %p1281_p0, %p1275_p11 }
  0x22   : > { %1285 = shalt.err (!%p1282_p2)
}
  0x23   : > { %1159 = dma.hbm_to_vmem [thread:$0]  (!%p1551_p7), %s249_s10, 64, %s252_s12, %s1564_s13  }
  0x24   : > { %s1575_s25 = sadd.s32 4294967295, %s1456_s23   ;;  %s984_s26 = sadd.s32 4294967294, %s1456_s23  }
  0x25   : > { %p57_p4 = scmp.ne.s32.totalorder %s1440_s19, %s1436_s18  ;;  %p1786_p5 = scmp.eq.s32.totalorder %s1575_s25, 0 }
  0x26   : > { %p179_p6 = scmp.eq.s32.totalorder %s1575_s25, 1  ;;  %p185_p9 = scmp.eq.s32.totalorder %s984_s26, 1 }
  0x27   : > { %p985_p10 = scmp.ge.s32.totalorder %s1456_s23, 1  ;;  %p1585_p11 = por %p1786_p5, %p57_p4 }
  0x28   : > { %p1592_p12 = por %p179_p6, %p51_p1  ;;  %p1596_p13 = por %p185_p9, %p57_p4 }
  0x29   : > { %p192_p0 = scmp.lt.s32.totalorder %s1456_s23, 3  ;;  %s1459_s11 = smov [#allocation12]  }
  0x2a   : > { %s204_s12 = sshll.u32 %s1459_s11, 4  ;;  %s225_s26 = scalar_lea.vmem [#allocation6], %s1546_s28  ;;  %s205_s12 = int_to_ptr.vmem [resolvable:$true] %s204_s12 }
  0x2b   : > { %p1601_p2 = pnand %p985_p10, %p192_p0  ;;  %s232_s27 = sshll.u32 %s225_s26, 4  ;;  %s1618_s27 = int_to_ptr.vmem [resolvable:$true] %s232_s27 }
  0x2c   : > { %s1297_s11 = scalar_lea.vmem %s205_s12, 3072  ;;  %p1305_p0 = scmp.lt.s32.totalorder %s205_s12, %s205_s12 }
  0x2d   : > { %p1149_p3 = pneg %p1601_p2  ;;  %p1298_p6 = scmp.ne.s32.totalorder %s205_s12, %s1297_s11 }
  0x2f   : > { %p1609_p1 = pnand %p1149_p3, %p1786_p5  ;;  %p1306_p3 = scmp.lt.s32.totalorder %s1297_s11, %s1297_s11 }
  0x31   : > { %p1288_p4 = pneg %p1609_p1  ;;  %p1307_p5 = por %p1306_p3, %p1305_p0 }
  0x33   : > { %p1300_p9 = pnand %p1298_p6, %p1288_p4 }
  0x35   : > { %p1301_p10 = pneg %p1300_p9 }
  0x37   : > { %p1308_p8 = pnand %p1307_p5, %p1301_p10 }
  0x39   : > { %1311 = shalt.err (!%p1308_p8)
}
  0x3a   : > { %s1460_s1 = smov 64   ;;  %s1461_s15 = smov 4  }
  0x3b   : > { %1152 = dma.hbm_to_vmem [thread:$0]  (!%p1609_p1), %s1782_s3, 3072, %s205_s12, [#allocation13], %s1460_s1, %s1460_s1, %s1461_s15  }
  0x3c   : > { %s1804_s17 = sand.u32 1, %s1444_s20   ;;  %s1325_s22 = scalar_lea.vmem %s1618_s27, 64 }
  0x3d   : > { %s222_s24 = scalar_lea.sflag [#allocation7], %s1804_s17  ;;  %p1326_p4 = scmp.ne.s32.totalorder %s1618_s27, %s1325_s22 }
  0x3e   : > { %p1805_p5 = pneg %p1551_p7  ;;  %s1462_s11 = smov [#allocation6]  }
  0x3f   : > { %s1330_s6 = sshll.u32 %s1462_s11, 4  ;;  %s1331_s6 = int_to_ptr.vmem [resolvable:$false] %s1330_s6 }
  0x40   : > { %p1328_p8 = pnand %p1326_p4, %p1805_p5  ;;  %s1332_s23 = scalar_lea.vmem %s1331_s6, 128 }
  0x41   : > { %p1333_p9 = scmp.lt.s32.totalorder %s1618_s27, %s1331_s6  ;;  %p1334_p10 = scmp.lt.s32.totalorder %s1332_s23, %s1325_s22 }
  0x42   : > { %p1329_p6 = pneg %p1328_p8 }
  0x43   : > { %p1335_p0 = por %p1334_p10, %p1333_p9 }
  0x45   : > { %p1336_p3 = pnand %p1335_p0, %p1329_p6 }
  0x47   : > { %1339 = shalt.err (!%p1336_p3)
}
  0x48   : > { %s1806_s14 = scalar_lea.hbm %s1779_s0, %s1549_s29  ;;  %s268_s6 = scalar_lea.hbm %s1781_s2, %s1549_s29 }
  0x49   : > { %1156 = dma.hbm_to_vmem [thread:$0]  (!%p1551_p7), %s1806_s14, 64, %s1618_s27, %s222_s24  }
  0x4a   : > { %s262_s22 = scalar_lea.vmem [#allocation11], %s1546_s28  ;;  %p1807_p4 = pmov %p1805_p5 }
  0x4b   : > { %s270_s23 = sshll.u32 %s262_s22, 4  ;;  %s1463_s26 = smov [#allocation11]   ;;  %s271_s23 = int_to_ptr.vmem [resolvable:$true] %s270_s23 }
  0x4c   : > { %s1353_s16 = scalar_lea.vmem %s271_s23, 64  ;;  %s1358_s11 = sshll.u32 %s1463_s26, 4  ;;  %s1359_s11 = int_to_ptr.vmem [resolvable:$false] %s1358_s11 }
  0x4d   : > { %p1354_p1 = scmp.ne.s32.totalorder %s271_s23, %s1353_s16  ;;  %s1360_s1 = scalar_lea.vmem %s1359_s11, 128 }
  0x4e   : > { %p1361_p6 = scmp.lt.s32.totalorder %s271_s23, %s1359_s11  ;;  %p1362_p9 = scmp.lt.s32.totalorder %s1360_s1, %s1353_s16 }
  0x4f   : > { %p1356_p5 = pnand %p1354_p1, %p1807_p4 }
  0x50   : > { %p1363_p10 = por %p1362_p9, %p1361_p6 }
  0x51   : > { %p1357_p8 = pneg %p1356_p5 }
  0x53   : > { %p1364_p0 = pnand %p1363_p10, %p1357_p8 }
  0x55   : > { %1367 = shalt.err (!%p1364_p0)
}
  0x56   : > { %1162 = dma.hbm_to_vmem [thread:$0]  (!%p1551_p7), %s268_s6, 64, %s271_s23, %s1564_s13  }
  0x57   : > { %279 = sbr.rel (%p1601_p2) target bundleno = 1118 (0x45e), region = 40  ;;  %s1657_s24 = sand.u32 (!%p1601_p2), 1, %s1440_s19  }
  0x58   : > { %s1660_s27 = sshll.u32 (!%p1601_p2), %s1657_s24, 2  ;;  %s282_s28 = scalar_lea.sflag (!%p1601_p2), [#allocation7], %s1657_s24 }
  0x59   : > { %s285_s29 = scalar_lea.vmem (!%p1601_p2), [#allocation6], %s1660_s27 }
  0x5c   : > { %1419 = dma.done.wait (%p1585_p11), %s282_s28, 64  }
  0x5d   : > { %1421 = vsyncadd (%p1585_p11), %s282_s28, 4294967232  ;;  %s290_s30 = sand.u32 1, %s1575_s25   ;;  %s294_s10 = scalar_lea.vmem [#allocation9], %s1660_s27 }
  0x5e   : > { %s291_s13 = scalar_lea.sflag [#allocation10], %s290_s30 }
  0x5f   : > { %1423 = dma.done.wait (%p1585_p11), %s291_s13, 128  }
  0x60   : > { %1425 = vsyncadd (%p1585_p11), %s291_s13, 4294967168  ;;  %s303_s12 = scalar_lea.vmem [#allocation11], %s1660_s27  ;;  %p1808_p7 = scmp.eq.s32.totalorder %s1575_s25, 0 }
  0x62   : > { %1427 = dma.done.wait (%p1808_p7), [#allocation13], 3072   ;;  %p1809_p2 = pmov %p1808_p7 }
  0x63   : > { %v1464_v0 = vmov 0.0   ;;  %vm1465_vm0 = vmmov 0   ;;  %v1228_v1 = vld [vmem:[#allocation12 + $0x38] sm:$0xff]   ;;  %v1230_v3 = vld [vmem:[#allocation12 + $0x30] sm:$0xff]   ;;  %v1232_v5 = vld [vmem:[#allocation12 + $0x28] sm:$0xff]   ;;  %vm464_vm1 = vcmask 7168  }
  0x64   : > { %1429 = vsyncadd (%p1809_p2), [#allocation13], 4294964224  ;;  %1065 = vmatprep.subr.bf16.mxu0 %v1464_v0  ;;  %1085 = vmatprep.subr.bf16.mxu1 %v1464_v0  ;;  %v1229_v2 = vld [vmem:[#allocation12 + $0x78] sm:$0xff]   ;;  %v1231_v4 = vld [vmem:[#allocation12 + $0x70] sm:$0xff]   ;;  %v1466_v36 = vmov -inf   ;;  %466 = vst.msk [vmem:[#allocation4] sm:$0xff] %vm464_vm1, %v1464_v0 }
  0x65   : > { %1081 = vmatprep.mubr.msk.bf16.mxu0 %vm1465_vm0, %v1464_v0  ;;  %1101 = vmatprep.mubr.msk.bf16.mxu1 %vm1465_vm0, %v1464_v0  ;;  %v1233_v6 = vld [vmem:[#allocation12 + $0x68] sm:$0xff]   ;;  %v1234_v7 = vld [vmem:[#allocation12 + $0x20] sm:$0xff]   ;;  %v1236_v9 = vld [vmem:[#allocation12 + $0x18] sm:$0xff]   ;;  %465 = vst.msk [vmem:[#allocation3] sm:$0xff] %vm464_vm1, %v1466_v36  ;;  %vm739_vm2 = vcmask 64512   ;;  %v1467_v50 = vmov 0  }
  0x66   : > { %1066 = vmatpush3.bf16.msra.mxu0 %v1228_v1  ;;  %1086 = vmatpush3.bf16.msra.mxu1 %v1229_v2  ;;  %v1235_v8 = vld [vmem:[#allocation12 + $0x60] sm:$0xff]   ;;  %v1237_v10 = vld [vmem:[#allocation12 + $0x58] sm:$0xff]   ;;  %v1238_v11 = vld [vmem:[#allocation12 + $0x10] sm:$0xff]   ;;  %vm775_vm3 = vcmask 1043456   ;;  %s999_s22 = sshll.u32 %s1657_s24, 3  ;;  %s1031_s23 = sshll.u32 %s1448_s21, 7 }
  0x67   : > { %1067 = vmatprep.subr.bf16.mxu0 %v1464_v0  ;;  %1087 = vmatprep.subr.bf16.mxu1 %v1464_v0  ;;  %v1239_v12 = vld [vmem:[#allocation12 + $0x50] sm:$0xff]   ;;  %v1240_v13 = vld [vmem:[#allocation12 + $0x8] sm:$0xff]   ;;  %v1242_v15 = vld [vmem:[#allocation12] sm:$0xff]   ;;  %s343_s16 = scalar_lea.vmem [#allocation14], %s999_s22  ;;  %vm834_vm4 = vcmask 130048   ;;  %s848_s27 = scalar_lea.hbm %s1784_s5, %s1031_s23 }
  0x68   : > { %v1241_v14 = vld [vmem:[#allocation12 + $0x48] sm:$0xff]   ;;  %v1243_v16 = vld [vmem:[#allocation12 + $0x40] sm:$0xff]   ;;  %v468_v18 = vld [vmem:[%s294_s10] sm:$0xf]  ;;  %1226 = vset.pattern.permute.xlu0 %v1467_v50  ;;  %1227 = vset.pattern.permute.xlu1 %v1467_v50  ;;  %s850_s26 = sshll.u32 %s343_s16, 4  ;;  %s837_s28 = scalar_lea.sflag [#allocation8], %s1657_s24  ;;  %s851_s26 = int_to_ptr.vmem [resolvable:$true] %s850_s26 }
  0x69   : > { %v349_v17 = vld [vmem:[%s285_s29] sm:$0xf]  ;;  %v1000_v19 = vld [vmem:[%s1783_s4] ss:$0 sm:$0xff]  ;;  %v1010_v20 = vld [vmem:[%s1783_s4 + $0x1] ss:$0 sm:$0xff] }
  0x6a   : > { %1068 = vmatpush3.bf16.msra.mxu0 %v1230_v3  ;;  %1088 = vmatpush3.bf16.msra.mxu1 %v1231_v4  ;;  %v1244_v35 = vld [vmem:[#allocation12 + $0xb8] sm:$0xff]   ;;  %v1245_v37 = vld [vmem:[#allocation12 + $0xb0] sm:$0xff]   ;;  %v1246_v38 = vld [vmem:[#allocation12 + $0xa8] sm:$0xff]   ;;  %s1368_s29 = scalar_lea.vmem %s851_s26, 128  ;;  %s1468_s30 = smov [#allocation14]  }
  0x6b   : > { %1069 = vmatprep.subr.bf16.mxu0 %v1464_v0  ;;  %1089 = vmatprep.subr.bf16.mxu1 %v1464_v0  ;;  %v1247_v39 = vld [vmem:[#allocation12 + $0xa0] sm:$0xff]   ;;  %v1248_v40 = vld [vmem:[#allocation12 + $0x98] sm:$0xff]   ;;  %v1249_v41 = vld [vmem:[#allocation12 + $0x90] sm:$0xff]   ;;  %p1369_p11 = scmp.ne.s32.totalorder %s851_s26, %s1368_s29  ;;  %s1372_s21 = sshll.u32 %s1468_s30, 4  ;;  %s1373_s21 = int_to_ptr.vmem [resolvable:$false] %s1372_s21 }
  0x6c   : > { %v1250_v42 = vld [vmem:[#allocation12 + $0x88] sm:$0xff]   ;;  %v1251_v43 = vld [vmem:[#allocation12 + $0x80] sm:$0xff]   ;;  %v582_v44 = vld [vmem:[%s303_s12] sm:$0xf]  ;;  %s1374_s13 = scalar_lea.vmem %s1373_s21, 256  ;;  %p1375_p4 = scmp.lt.s32.totalorder %s851_s26, %s1373_s21 }
  0x6d   : > { %v738_v51 = vld [vmem:[#allocation3] sm:$0xff]  ;;  %v1020_v55 = vld [vmem:[%s1783_s4 + $0x2] ss:$0 sm:$0xff]  ;;  %p1370_p3 = pnand %p1369_p11, %p1592_p12  ;;  %p1376_p5 = scmp.lt.s32.totalorder %s1374_s13, %s1368_s29 }
  0x6e   : > { %1070 = vmatpush3.bf16.msra.mxu0 %v1232_v5  ;;  %1090 = vmatpush3.bf16.msra.mxu1 %v1233_v6 }
  0x6f   : > { %1071 = vmatprep.subr.bf16.mxu0 %v1464_v0  ;;  %1091 = vmatprep.subr.bf16.mxu1 %v1464_v0  ;;  %p1371_p1 = pneg %p1370_p3  ;;  %p1377_p8 = por %p1376_p5, %p1375_p4 }
  0x71   : > { %p1378_p6 = pnand %p1377_p8, %p1371_p1 }
  0x72   : > { %1072 = vmatpush3.bf16.msra.mxu0 %v1234_v7  ;;  %1092 = vmatpush3.bf16.msra.mxu1 %v1235_v8  ;;  %v755_v7 = vld [vmem:[#allocation4] sm:$0xff] }
  0x73   : > { %1073 = vmatprep.subr.bf16.mxu0 %v1464_v0  ;;  %1093 = vmatprep.subr.bf16.mxu1 %v1464_v0 }
  0x76   : > { %1074 = vmatpush3.bf16.msra.mxu0 %v1236_v9  ;;  %1094 = vmatpush3.bf16.msra.mxu1 %v1237_v10 }
  0x77   : > { %1075 = vmatprep.subr.bf16.mxu0 %v1464_v0  ;;  %1095 = vmatprep.subr.bf16.mxu1 %v1464_v0 }
  0x7a   : > { %1076 = vmatpush3.bf16.msra.mxu0 %v1238_v11  ;;  %1096 = vmatpush3.bf16.msra.mxu1 %v1239_v12 }
  0x7b   : > { %1077 = vmatprep.subr.bf16.mxu0 %v1464_v0  ;;  %1097 = vmatprep.subr.bf16.mxu1 %v1464_v0 }
  0x7e   : > { %1078 = vmatpush3.bf16.msra.mxu0 %v1240_v13  ;;  %1098 = vmatpush3.bf16.msra.mxu1 %v1241_v14 }
  0x7f   : > { %1079 = vmatprep.subr.bf16.mxu0 %v1464_v0  ;;  %1099 = vmatprep.subr.bf16.mxu1 %v1464_v0 }
  0x82   : > { %1080 = vmatpush3.bf16.msra.mxu0 %v1242_v15  ;;  %1100 = vmatpush3.bf16.msra.mxu1 %v1243_v16 }
  0x83   : > { %1105 = vmatprep.subr.bf16.mxu0 %v1464_v0  ;;  %1125 = vmatprep.subr.bf16.mxu1 %v1464_v0 }
  0x85   : > { %1082 = vmatmul.mubr.bf16.vlgmr.msra.gmra.mxu0 %v349_v17  ;;  %1102 = vmatmul.mubr.bf16.vlgmr.msra.gmra.mxu1 %v468_v18 }
  0x86   : > { %1121 = vmatprep.mubr.msk.bf16.mxu0 %vm1465_vm0, %v1464_v0  ;;  %1127 = vmatprep.mubr.msk.bf16.mxu1 %vm1465_vm0, %v1464_v0 }
  0x87   : > { %1106 = vmatpush3.bf16.msra.mxu0 %v1244_v35 }
  0x88   : > { %1107 = vmatprep.subr.bf16.mxu0 %v1464_v0 }
  0x8b   : > { %1108 = vmatpush3.bf16.msra.mxu0 %v1245_v37 }
  0x8c   : > { %1109 = vmatprep.subr.bf16.mxu0 %v1464_v0 }
  0x8f   : > { %1110 = vmatpush3.bf16.msra.mxu0 %v1246_v38 }
  0x90   : > { %1111 = vmatprep.subr.bf16.mxu0 %v1464_v0 }
  0x93   : > { %1112 = vmatpush3.bf16.msra.mxu0 %v1247_v39 }
  0x94   : > { %1113 = vmatprep.subr.bf16.mxu0 %v1464_v0 }
  0x97   : > { %1114 = vmatpush3.bf16.msra.mxu0 %v1248_v40 }
  0x98   : > { %1115 = vmatprep.subr.bf16.mxu0 %v1464_v0 }
  0x9b   : > { %1116 = vmatpush3.bf16.msra.mxu0 %v1249_v41 }
  0x9c   : > { %1117 = vmatprep.subr.bf16.mxu0 %v1464_v0 }
  0x9f   : > { %1118 = vmatpush3.bf16.msra.mxu0 %v1250_v42 }
  0xa0   : > { %1119 = vmatprep.subr.bf16.mxu0 %v1464_v0 }
  0xa3   : > { %1120 = vmatpush3.bf16.msra.mxu0 %v1251_v43 }
  0xa6   : > { %1122 = vmatmul.mubr.bf16.vlgmr.msra.gmra.mxu0 %v582_v44 }
 0x145   : > { %v455_v21 = vpop.f32.mrf.mxu0  ;;  %v576_v23 = vpop.f32.mrf.mxu1 }
 0x146   : > { %v456_v22 = vadd.f32 %v1000_v19, %v455_v21  ;;  %v577_v24 = vadd.f32 %v1010_v20, %v576_v23 }
 0x147   : > { %v1083_v25 = vpop.f32.mrf.mxu0  ;;  %v1103_v27 = vpop.f32.mrf.mxu1 }
 0x148   : > { %v461_v26 = vmul.f32 0.25, %v456_v22  ;;  %v697_v28 = vpack.c.bf16 %v577_v24, %v577_v24 }
 0x149   : > { %v458_v29 = vpop.f32.mrf.mxu0  ;;  %v579_v31 = vpop.f32.mrf.mxu1 }
 0x14a   : > { %v462_v30 = vpack.c.bf16 %v461_v26, %v461_v26  ;;  %1126 = vmatpush3.bf16.xpose.msra.mxu1 %v697_v28 }
 0x14b   : > { %v1084_v32 = vpop.f32.mrf.mxu0  ;;  %v1104_v33 = vpop.f32.mrf.mxu1  ;;  %1131 = vmatprep.subr.bf16.mxu1 %v1464_v0 }
 0x14c   : > { %463 = vst [vmem:[#allocation2] sm:$0xf] %v462_v30 }
 0x153   : > { %v696_v34 = vld [vmem:[#allocation2] sm:$0xf] }
 0x154   : > { %1128 = vmatmul.mubr.bf16.vlgmr.msra.gmra.mxu1 %v696_v34 }
 0x155   : > { %1133 = vmatprep.mubr.msk.bf16.mxu1 %vm1465_vm0, %v1464_v0 }
 0x166   : > { %v690_v56 = vpop.f32.mrf.mxu0 }
 0x167   : > { %v691_v57 = vadd.f32 %v1020_v55, %v690_v56 }
 0x168   : > { %v1123_v58 = vpop.f32.mrf.mxu0 }
 0x169   : > { %v771_v59 = vpack.c.bf16 %v691_v57, %v691_v57 }
 0x16a   : > { %v693_v60 = vpop.f32.mrf.mxu0 }
 0x16b   : > { %v777_v61 = vsel %vm775_vm3, %v771_v59, 0 }
 0x16c   : > { %1132 = vmatpush3.bf16.msra.mxu1 %v777_v61  ;;  %v1124_v62 = vpop.f32.mrf.mxu0 }
 0x214   : > { %v732_v45 = vpop.f32.mrf.mxu1 }
 0x215   : > { %v740_v46 = vsel %vm739_vm2, %v732_v45, -inf }
 0x216   : > { %741 = vmax.xlane.f32.xlu0 %v740_v46  ;;  %v1129_v47 = vpop.f32.mrf.mxu1 }
 0x218   : > { %v735_v48 = vpop.f32.mrf.mxu1 }
 0x21a   : > { %v1130_v49 = vpop.f32.mrf.mxu1 }
 0x29f   : > { %v742_v52 = vpop.xlane.xlu0 %741 }
 0x2a0   : > { %v743_v53 = vmax.f32 %v738_v51, %v742_v52 }
 0x2a2   : > { %v744_v54 = vsub.f32 %v738_v51, %v743_v53  ;;  %821 = vst.msk [vmem:[#allocation3] sm:$0xff] %vm464_vm1, %v743_v53  ;;  %749 = vperm.xlu0 %1226, %v743_v53  }
 0x2a4   : > { %v745_v3 = vmul.f32 1.442695, %v744_v54 }
 0x31d   : > { %v750_v63 = vpop.permute.xlu0 %749 }
 0x31e   : > { %v752_v0 = vsub.f32 %v732_v45, %v750_v63 }
 0x320   : > { %v753_v1 = vmul.f32 1.442695, %v752_v0 }
 0x322   : > { %1252 = vpow2.f32 %v753_v1 }
 0x323   : > { %1254 = vpow2.f32 %v745_v3 }
 0x32f   : > { %v1253_v2 = vpop.eup %1252 }
 0x330   : > { %v757_v4 = vsel %vm739_vm2, %v1253_v2, 0.0  ;;  %v770_v5 = vpack.c.bf16 %v1253_v2, %v1253_v2  ;;  %v1255_v6 = vpop.eup %1254 }
 0x331   : > { %758 = vadd.xlane.f32.xlu1 %v757_v4  ;;  %v756_v8 = vmul.f32 %v1255_v6, %v755_v7 }
 0x332   : > { %1134 = vmatmul.mubr.msk.bf16.vlgmr.msra.gmra.mxu1 %vm739_vm2, %v770_v5 }
 0x342   : > { %766 = vperm.xlu1 %1227, %v1255_v6  }
 0x3ba   : > { %v759_v9 = vpop.xlane.xlu1 %758 }
 0x3bb   : > { %v760_v10 = vadd.f32 %v759_v9, %v756_v8 }
 0x3bd   : > { %762 = vst.msk [vmem:[#allocation4] sm:$0xff] %vm464_vm1, %v760_v10 }
 0x3be   : > { %v767_v17 = vpop.permute.xlu1 %766 }
 0x3bf   : > { %v769_v18 = vmul.f32 0.0, %v767_v17 }
 0x3c4   : > { %v826_v11 = vld [vmem:[#allocation4] sm:$0xff] }
 0x3c5   : > { %1256 = vrcp.f32 %v826_v11 }
 0x3d2   : > { %v1257_v12 = vpop.eup %1256 }
 0x3d3   : > { %830 = vperm.xlu1 %1227, %v1257_v12  }
 0x3f2   : > { %v813_v13 = vpop.f32.mrf.mxu1 }
 0x3f3   : > { %v819_v19 = vadd.f32 %v813_v13, %v769_v18 }
 0x3f4   : > { %v1135_v14 = vpop.f32.mrf.mxu1 }
 0x3f6   : > { %v816_v15 = vpop.f32.mrf.mxu1 }
 0x3f8   : > { %v1136_v16 = vpop.f32.mrf.mxu1 }
 0x44e   : > { %v831_v20 = vpop.permute.xlu1 %830 }
 0x44f   : > { %v833_v21 = vmul.f32 %v831_v20, %v819_v19 }
 0x451   : > { %835 = vst.msk [vmem:[%s343_s16] sm:$0xff] %vm834_vm4, %v833_v21 }
 0x452   : > { %1381 = shalt.err (!%p1378_p6)
}
 0x453   : > { %s1382_s10 = scalar_lea.hbm %s848_s27, 128  ;;  %s1386_s25 = scalar_lea.hbm %s1784_s5, 256 }
 0x454   : > { %p1383_p9 = scmp.ne.s32.totalorder %s848_s27, %s1382_s10  ;;  %p1387_p7 = scmp.lt.s32.totalorder %s848_s27, %s1784_s5 }
 0x455   : > { %p1388_p2 = scmp.lt.s32.totalorder %s1386_s25, %s1382_s10 }
 0x456   : > { %p1384_p10 = pnand %p1383_p9, %p1592_p12 }
 0x457   : > { %p1389_p11 = por %p1388_p2, %p1387_p7 }
 0x458   : > { %p1385_p0 = pneg %p1384_p10 }
 0x45a   : > { %p1390_p3 = pnand %p1389_p11, %p1385_p0 }
 0x45c   : > { %1393 = shalt.err (!%p1390_p3)
}
 0x45d   : > { %1147 = dma.vmem_to_hbm [thread:$0]  (%p1592_p12), %s851_s26, 128, %s848_s27, %s837_s28  }
 0x45e PF: > { %s1810_s17 = sld [smem:[#allocation20_spill]]  ;;  %s862_s15 = sand.u32 1, %s1436_s18  }
 0x45f   : > { %s863_s6 = scalar_lea.sflag [#allocation8], %s862_s15 }
 0x464   : > { %p1811_p1 = scmp.ge.s32.totalorder %s1810_s17, 2 }
 0x466   : > { %p1164_p4 = pnand %p1811_p1, %p1596_p13 }
 0x468   : > { %p1165_p5 = pneg %p1164_p4 }
 0x46a   : > { %1431 = dma.done.wait (%p1165_p5), %s863_s6, 128  }
 0x46b   : > { %1433 = vsyncadd (%p1165_p5), %s863_s6, 4294967168  ;;  %s25_s23 = sadd.s32 1, %s1810_s17   ;;  %s1812_s22 = sld [smem:[#allocation22_spill]] }
 0x46c   : > { %p22_p8 = scmp.ge.s32.totalorder %s25_s23, 4   ;;  %s1813_s21 = sld [smem:[#allocation19_spill]] }
 0x46d   : > { %s1814_s8 = sld [smem:[#allocation21_spill]]  ;;  %s1815_s18 = smov %s1440_s19 }
 0x46e   : > { %s1816_s19 = smov %s1444_s20 }
 0x46f   :  { %24 = sbr.rel (!%p22_p8) target bundleno = 11 (0xb), region = 125 }
 0x471   : > { %s1817_s20 = smov %s1812_s22 }
 0x473   : > { %s1818_s22 = smov %s1814_s8 }
 0x474   :  { %868 = vsyncpa [#allocation7], 1 }
 0x475   :  { %870 = vsyncpa [#allocation7 + $0x1], 1 }
 0x476   :  { %871 = vsyncpa [#allocation10], 1 }
 0x477   :  { %873 = vsyncpa [#allocation10 + $0x1], 1 }
 0x478   :  { %874 = vsyncpa [#allocation13], 1 }
 0x479   :  { %875 = vsyncpa [#allocation8], 1 }
 0x47a   :  { %877 = vsyncpa [#allocation8 + $0x1], 1 }

</bundles_post_ra>
